<compile_context>
chip_gen: v7x
topology: tpu7x:2x2x1
jax: 0.10.0
libtpu: 0.0.40
codegen_flags: <defaults>
</compile_context>

<pallas_src>
import functools

import jax
import jax.numpy as jnp
from jax import lax
from jax.experimental import pallas as pl
from jax.experimental.pallas import tpu as pltpu

BN_EPS = 1e-5
_LANES = 128


def _round_up(n, m):
    return ((n + m - 1) // m) * m


def _vmem_capacity_bytes():
    try:
        return int(pltpu.get_tpu_info().vmem_capacity_bytes)
    except Exception:
        return 128 << 20  # conservative v5e/v6e-class default


_HAS_BUFFERED = hasattr(pl, "Buffered")


def _spec(shape, index_map, *, single_buffer=False):
    """BlockSpec; constant-index blocks are single-buffered when supported."""
    if single_buffer and _HAS_BUFFERED:
        try:
            return pl.BlockSpec(shape, index_map, pipeline_mode=pl.Buffered(1))
        except TypeError:
            pass
    return pl.BlockSpec(shape, index_map)


# -----------------------------------------------------------------------------
# Kernel. Shapes per grid step:
#   x_ref : (block_b, D)   native PyTorch layout, batch on sublanes
#   w1    : (H, D)   b1 : (H, 1)     (BN1 folded in)
#   w2    : (H, H)   b2 : (H, 1)     (BN2 folded in)
#   w3    : (H, 1)   b3 : (1, 1)
#   o_ref : (1, block_b)             lane-dense output row
# -----------------------------------------------------------------------------
def expertnet_kernel(x_ref, w1_ref, b1_ref, w2_ref, b2_ref, w3_ref, b3_ref, o_ref):
    cdt = w1_ref.dtype                      # MXU operand dtype (f32 here; bf16 if params are bf16)
    x = x_ref[...].astype(cdt)              # (block_b, D)

    # Layer 1: contract over D (last dim of BOTH operands) -> (H, block_b), batch on lanes.
    h = lax.dot_general(w1_ref[...], x,
                        dimension_numbers=(((1,), (1,)), ((), ())),
                        preferred_element_type=jnp.float32)
    h = jnp.maximum(h + b1_ref[...].astype(jnp.float32), 0.0)     # Dropout -> identity (eval)

    # Layer 2: (H, H) @ (H, block_b).
    h = jnp.dot(w2_ref[...], h.astype(cdt), preferred_element_type=jnp.float32)
    h = jnp.maximum(h + b2_ref[...].astype(jnp.float32), 0.0)     # Dropout -> identity (eval)

    # Layer 3: single output row -> VPU broadcast-mul + sublane (XLU) reduce; no MXU fill/drain.
    out = jnp.sum(w3_ref[...].astype(jnp.float32) * h, axis=0, keepdims=True)
    o_ref[...] = (out + b3_ref[...].astype(jnp.float32)).astype(o_ref.dtype)


@functools.partial(jax.jit, static_argnames=("max_block_b",))
def expertnet_forward(x, params, *, max_block_b=1024):
    """x: (B, D) row-major (PyTorch layout, used as-is). Returns (B, 1) float32."""
    assert max_block_b % _LANES == 0
    B, D = x.shape
    H = params["w1"].shape[0]
    p_size = jnp.dtype(params["w1"].dtype).itemsize
    x_size = jnp.dtype(x.dtype).itemsize

    # --- generation-aware VMEM budget & batch-tile choice ----------------------
    budget = int(_vmem_capacity_bytes() * 0.85)       # headroom for Mosaic scratch (v7x: 64 MiB phys)
    param_bytes = p_size * (H * D + H * H + 3 * H + 1)
    n_param_bufs = 1 if _HAS_BUFFERED else 2          # Buffered(1): weights resident once
    slack = 2 << 20

    def step_bytes(bb):
        return (2 * bb * D * x_size                    # x tile, double-buffered
                + 2 * bb * 4                           # f32 output tile, double-buffered
                + 2 * H * bb * 4)                      # f32 layer-1/2 activations

    if B < _LANES:
        block_b = _round_up(B, 8)                      # single small tile
    else:
        block_b = min(max_block_b, _round_up(B, _LANES))
        # shrink until the resident footprint fits the per-generation budget
        while (n_param_bufs * param_bytes + step_bytes(block_b) + slack > budget
               and block_b > _LANES):
            nb = max(_LANES, _round_up(block_b // 2, _LANES))
            if nb == block_b:
                break
            block_b = nb
        # megacore: v7x has 2 TensorCores -> keep >= 2 parallel grid steps for large batches
        if pl.cdiv(B, block_b) < 2:
            block_b = max(_LANES, _round_up(pl.cdiv(B, 2), _LANES))

    n_blocks = pl.cdiv(B, block_b)
    b_pad = n_blocks * block_b                         # output padded only; x read as-is (partial last block)
    grid = (n_blocks,)

    vmem_need = n_param_bufs * param_bytes + step_bytes(block_b) + slack
    vmem_limit = int(min(max(2 * vmem_need, 32 << 20), budget))

    const = lambda i: (0, 0)
    in_specs = [
        pl.BlockSpec((block_b, D), lambda i: (i, 0)),  # x tile, native (B, D) layout
        _spec((H, D), const, single_buffer=True),      # w1 (BN1 folded)
        _spec((H, 1), const, single_buffer=True),      # b1
        _spec((H, H), const, single_buffer=True),      # w2 (BN2 folded)
        _spec((H, 1), const, single_buffer=True),      # b2
        _spec((H, 1), const, single_buffer=True),      # w3 (column layout for VPU reduce)
        _spec((1, 1), const, single_buffer=True),      # b3
    ]
    out_specs = pl.BlockSpec((1, block_b), lambda i: (0, i))   # lane-dense output row

    flops = 2 * B * (D * H + H * H) + 2 * B * H
    bytes_accessed = x_size * B * D + param_bytes + 4 * B
    cost = pl.CostEstimate(flops=int(flops), transcendentals=0,
                           bytes_accessed=int(bytes_accessed))

    out = pl.pallas_call(
        expertnet_kernel,
        out_shape=jax.ShapeDtypeStruct((1, b_pad), jnp.float32),
        grid_spec=pltpu.PrefetchScalarGridSpec(
            num_scalar_prefetch=0,
            grid=grid,
            in_specs=in_specs,
            out_specs=out_specs,
        ),
        compiler_params=pltpu.CompilerParams(
            dimension_semantics=("parallel",),
            vmem_limit_bytes=vmem_limit,
        ),
        cost_estimate=cost,
    )(
        x,
        params["w1"], params["b1"],
        params["w2"], params["b2"],
        params["w3"], params["b3"],
    )
    return out[:, :B].T   # (B, 1), PyTorch layout


# -----------------------------------------------------------------------------
# One-time parameter transforms (outside the kernel / per-call path)
# -----------------------------------------------------------------------------
def _fold_bn(w, b, gamma, beta, mean, var, eps=BN_EPS):
    """Fold eval-mode BatchNorm1d into the preceding Linear (PyTorch (out,in) W)."""
    s = gamma / jnp.sqrt(var + eps)
    return w * s[:, None], (b - mean) * s + beta


def fold_expertnet_params(raw, param_dtype=jnp.float32):
    """One-time transform: BN folding + kernel-friendly (column-bias) shapes.

    param_dtype=jnp.bfloat16 halves HBM/VMEM traffic on all generations (incl. v5e:
    its MXU consumes bf16 natively; bias/ReLU math stays f32 in-kernel). fp8 (v7x)
    / int8 (v6e) weight quantization is a further option once matmuls dominate.
    """
    w1, b1 = _fold_bn(raw["w1"], raw["b1"], raw["g1"], raw["beta1"], raw["m1"], raw["v1"])
    w2, b2 = _fold_bn(raw["w2"], raw["b2"], raw["g2"], raw["beta2"], raw["m2"], raw["v2"])
    H = w1.shape[0]
    return dict(
        w1=w1.astype(param_dtype),
        b1=b1.reshape(H, 1).astype(param_dtype),
        w2=w2.astype(param_dtype),
        b2=b2.reshape(H, 1).astype(param_dtype),
        w3=raw["w3"].reshape(H, 1).astype(param_dtype),   # (H, 1) column for the VPU head
        b3=raw["b3"].reshape(1, 1).astype(param_dtype),
    )


def init_raw_params(key, input_dim, hidden_dim):
    """PyTorch-layout raw parameters (Linear weight is (out, in))."""
    ks = jax.random.split(key, 8)
    f32 = jnp.float32
    return dict(
        w1=jax.random.normal(ks[0], (hidden_dim, input_dim), f32) * 0.1,
        b1=jax.random.normal(ks[1], (hidden_dim,), f32) * 0.1,
        g1=jnp.ones((hidden_dim,), f32) * 1.1,
        beta1=jnp.full((hidden_dim,), 0.05, f32),
        m1=jax.random.normal(ks[6], (hidden_dim,), f32) * 0.05,
        v1=jnp.ones((hidden_dim,), f32) + 0.1,
        w2=jax.random.normal(ks[2], (hidden_dim, hidden_dim), f32) * 0.1,
        b2=jax.random.normal(ks[3], (hidden_dim,), f32) * 0.1,
        g2=jnp.ones((hidden_dim,), f32) * 0.9,
        beta2=jnp.full((hidden_dim,), -0.02, f32),
        m2=jax.random.normal(ks[7], (hidden_dim,), f32) * 0.05,
        v2=jnp.ones((hidden_dim,), f32) + 0.1,
        w3=jax.random.normal(ks[4], (1, hidden_dim), f32) * 0.1,
        b3=jax.random.normal(ks[5], (1,), f32) * 0.1,
    )


def expertnet_reference(x, p, eps=BN_EPS):
    """Pure-JAX reference of the PyTorch eval forward pass (un-folded params)."""
    h = x @ p["w1"].T + p["b1"]
    h = (h - p["m1"]) / jnp.sqrt(p["v1"] + eps) * p["g1"] + p["beta1"]
    h = jnp.maximum(h, 0.0)
    h = h @ p["w2"].T + p["b2"]
    h = (h - p["m2"]) / jnp.sqrt(p["v2"] + eps) * p["g2"] + p["beta2"]
    h = jnp.maximum(h, 0.0)
    return h @ p["w3"].T + p["b3"]


if __name__ == "__main__":
    key = jax.random.PRNGKey(0)
    k_x, k_p = jax.random.split(key)

    batch, input_dim, hidden_dim = 8, 32, 32
    x = jax.random.normal(k_x, (batch, input_dim), jnp.float32)

    raw = init_raw_params(k_p, input_dim, hidden_dim)
    params = fold_expertnet_params(raw)   # one-time BN fold (f32; bf16 optional)

    out = expertnet_forward(x, params)
    out = jax.block_until_ready(out)

    ref = expertnet_reference(x, raw)
    assert out.shape == (batch, 1)
    err = float(jnp.max(jnp.abs(out - ref)))
    assert jnp.allclose(out, ref, atol=5e-4, rtol=5e-4), f"mismatch vs reference, max |err|={err:.3e}"

    # TODO(synk): training-mode Dropout(0.3) / BatchNorm batch-stats are not implemented
    # (this kernel targets the eval forward pass).

    print("KERNEL_OK")
</pallas_src>

<mosaic_0001>
module attributes {stable_mosaic.version = 11 : i64} {
  func.func @expertnet_kernel(%arg0: i32, %arg1: memref<8x32xf32, #tpu.memory_space<vmem>>, %arg2: memref<32x32xf32, #tpu.memory_space<vmem>>, %arg3: memref<32x1xf32, #tpu.memory_space<vmem>>, %arg4: memref<32x32xf32, #tpu.memory_space<vmem>>, %arg5: memref<32x1xf32, #tpu.memory_space<vmem>>, %arg6: memref<32x1xf32, #tpu.memory_space<vmem>>, %arg7: memref<1x1xf32, #tpu.memory_space<vmem>>, %arg8: memref<1x8xf32, #tpu.memory_space<vmem>>) attributes {dimension_semantics = [#tpu.dimension_semantics<parallel>], iteration_bounds = array<i64: 1>, scalar_prefetch = 0 : i64, scratch_operands = 0 : i64, tpu.core_type = #tpu.core_type<tc>, window_params = [{transform_indices = @transform_0, window_bounds = array<i64: 8, 32>}, {pipeline_mode = #tpu.pipeline_mode<synchronous>, transform_indices = @transform_1, window_bounds = array<i64: 32, 32>}, {pipeline_mode = #tpu.pipeline_mode<synchronous>, transform_indices = @transform_2, window_bounds = array<i64: 32, 1>}, {pipeline_mode = #tpu.pipeline_mode<synchronous>, transform_indices = @transform_3, window_bounds = array<i64: 32, 32>}, {pipeline_mode = #tpu.pipeline_mode<synchronous>, transform_indices = @transform_4, window_bounds = array<i64: 32, 1>}, {pipeline_mode = #tpu.pipeline_mode<synchronous>, transform_indices = @transform_5, window_bounds = array<i64: 32, 1>}, {pipeline_mode = #tpu.pipeline_mode<synchronous>, transform_indices = @transform_6, window_bounds = array<i64: 1, 1>}, {transform_indices = @transform_7, window_bounds = array<i64: 1, 8>}]} {
    %c0 = arith.constant 0 : index
    %c0_0 = arith.constant 0 : index
    %0 = vector.load %arg1[%c0, %c0_0] : memref<8x32xf32, #tpu.memory_space<vmem>>, vector<8x32xf32>
    %c0_1 = arith.constant 0 : index
    %c0_2 = arith.constant 0 : index
    %1 = vector.load %arg2[%c0_1, %c0_2] : memref<32x32xf32, #tpu.memory_space<vmem>>, vector<32x32xf32>
    %cst = arith.constant dense<0.000000e+00> : vector<32x8xf32>
    %2 = tpu.matmul %1, %0, %cst {dimension_numbers = #tpu.dot_dimension_numbers<[1], [1], [0], [0], [0, 0, 1, 0], [], []>} : vector<32x32xf32>, vector<8x32xf32>, vector<32x8xf32> -> vector<32x8xf32>
    %c0_3 = arith.constant 0 : index
    %c0_4 = arith.constant 0 : index
    %3 = vector.load %arg3[%c0_3, %c0_4] : memref<32x1xf32, #tpu.memory_space<vmem>>, vector<32x1xf32>
    %4 = vector.broadcast %3 : vector<32x1xf32> to vector<32x8xf32>
    %5 = arith.addf %2, %4 : vector<32x8xf32>
    %cst_5 = arith.constant 0.000000e+00 : f32
    %6 = vector.broadcast %cst_5 : f32 to vector<32x8xf32>
    %7 = arith.maximumf %5, %6 : vector<32x8xf32>
    %c0_6 = arith.constant 0 : index
    %c0_7 = arith.constant 0 : index
    %8 = vector.load %arg4[%c0_6, %c0_7] : memref<32x32xf32, #tpu.memory_space<vmem>>, vector<32x32xf32>
    %cst_8 = arith.constant dense<0.000000e+00> : vector<32x8xf32>
    %9 = tpu.matmul %8, %7, %cst_8 {dimension_numbers = #tpu.dot_dimension_numbers<[1], [0], [0], [1], [0, 0, 1, 1], [], []>} : vector<32x32xf32>, vector<32x8xf32>, vector<32x8xf32> -> vector<32x8xf32>
    %c0_9 = arith.constant 0 : index
    %c0_10 = arith.constant 0 : index
    %10 = vector.load %arg5[%c0_9, %c0_10] : memref<32x1xf32, #tpu.memory_space<vmem>>, vector<32x1xf32>
    %11 = vector.broadcast %10 : vector<32x1xf32> to vector<32x8xf32>
    %12 = arith.addf %9, %11 : vector<32x8xf32>
    %cst_11 = arith.constant 0.000000e+00 : f32
    %13 = vector.broadcast %cst_11 : f32 to vector<32x8xf32>
    %14 = arith.maximumf %12, %13 : vector<32x8xf32>
    %c0_12 = arith.constant 0 : index
    %c0_13 = arith.constant 0 : index
    %15 = vector.load %arg6[%c0_12, %c0_13] : memref<32x1xf32, #tpu.memory_space<vmem>>, vector<32x1xf32>
    %16 = vector.broadcast %15 : vector<32x1xf32> to vector<32x8xf32>
    %17 = arith.mulf %16, %14 : vector<32x8xf32>
    %cst_14 = arith.constant dense<0.000000e+00> : vector<8xf32>
    %18 = vector.multi_reduction <add>, %17, %cst_14 [0] : vector<32x8xf32> to vector<8xf32>
    %19 = vector.shape_cast %18 : vector<8xf32> to vector<1x8xf32>
    %c0_15 = arith.constant 0 : index
    %c0_16 = arith.constant 0 : index
    %20 = vector.load %arg7[%c0_15, %c0_16] : memref<1x1xf32, #tpu.memory_space<vmem>>, vector<1x1xf32>
    %21 = vector.broadcast %20 : vector<1x1xf32> to vector<1x8xf32>
    %22 = arith.addf %19, %21 : vector<1x8xf32>
    %c0_17 = arith.constant 0 : index
    %c0_18 = arith.constant 0 : index
    %23 = vector.load %arg8[%c0_17, %c0_18] : memref<1x8xf32, #tpu.memory_space<vmem>>, vector<1x8xf32>
    tpu.vector_store %arg8[%c0_17, %c0_18], %22 {strides = array<i32>} : memref<1x8xf32, #tpu.memory_space<vmem>>, vector<1x8xf32>,
    return
  }
  func.func @transform_0(%arg0: i32) -> (i32, i32) {
    %c0_i32 = arith.constant 0 : i32
    %c0_i32_0 = arith.constant 0 : i32
    return %arg0, %c0_i32 : i32, i32
  }
  func.func @transform_1(%arg0: i32) -> (i32, i32) {
    %c0_i32 = arith.constant 0 : i32
    %c0_i32_0 = arith.constant 0 : i32
    %c0_i32_1 = arith.constant 0 : i32
    return %c0_i32, %c0_i32_0 : i32, i32
  }
  func.func @transform_2(%arg0: i32) -> (i32, i32) {
    %c0_i32 = arith.constant 0 : i32
    %c0_i32_0 = arith.constant 0 : i32
    %c0_i32_1 = arith.constant 0 : i32
    return %c0_i32, %c0_i32_0 : i32, i32
  }
  func.func @transform_3(%arg0: i32) -> (i32, i32) {
    %c0_i32 = arith.constant 0 : i32
    %c0_i32_0 = arith.constant 0 : i32
    %c0_i32_1 = arith.constant 0 : i32
    return %c0_i32, %c0_i32_0 : i32, i32
  }
  func.func @transform_4(%arg0: i32) -> (i32, i32) {
    %c0_i32 = arith.constant 0 : i32
    %c0_i32_0 = arith.constant 0 : i32
    %c0_i32_1 = arith.constant 0 : i32
    return %c0_i32, %c0_i32_0 : i32, i32
  }
  func.func @transform_5(%arg0: i32) -> (i32, i32) {
    %c0_i32 = arith.constant 0 : i32
    %c0_i32_0 = arith.constant 0 : i32
    %c0_i32_1 = arith.constant 0 : i32
    return %c0_i32, %c0_i32_0 : i32, i32
  }
  func.func @transform_6(%arg0: i32) -> (i32, i32) {
    %c0_i32 = arith.constant 0 : i32
    %c0_i32_0 = arith.constant 0 : i32
    %c0_i32_1 = arith.constant 0 : i32
    return %c0_i32, %c0_i32_0 : i32, i32
  }
  func.func @transform_7(%arg0: i32) -> (i32, i32) {
    %c0_i32 = arith.constant 0 : i32
    %c0_i32_0 = arith.constant 0 : i32
    return %c0_i32, %arg0 : i32, i32
  }
}

</mosaic_0001>

<bundles_post_ra>
// kernel: expertnet_forward.1
= control target key start
LH: loop header
LB: loop body
LE: loop exit
PB: predicated region body
PF: predicated region fallthrough
CT: control target
= control target key end

     0   :  { %s575_s0 = inlined_call_operand.vmem [shape: f32[8,32], index: 0, kind: input, shape index: {}]   ;;  %s576_s1 = inlined_call_operand.vmem [shape: f32[32,32], index: 1, kind: input, shape index: {}]   ;;  %s577_s2 = inlined_call_operand.vmem [shape: f32[32,1], index: 2, kind: input, shape index: {}]   ;;  %s578_s3 = inlined_call_operand.vmem [shape: f32[32,32], index: 3, kind: input, shape index: {}]   ;;  %s579_s4 = inlined_call_operand.vmem [shape: f32[32,1], index: 4, kind: input, shape index: {}]   ;;  %s580_s5 = inlined_call_operand.vmem [shape: f32[32,1], index: 5, kind: input, shape index: {}]   ;;  %s581_s6 = inlined_call_operand.<no memory space> [shape: f32[1,1], index: 6, kind: input, shape index: {}]   ;;  %s582_s7 = inlined_call_operand.hbm [shape: f32[1,8], index: 7, kind: output, shape index: {}]  }
   0x1   :  { %v12_v0 = vstv %s581_s6 }
   0x2   :  { %13 = vst [vmem:[#allocation2] sm:$0x1] %v12_v0 }
   0x3   :  { %v29_v1 = vld [vmem:[%s575_s0] sm:$0xff]  ;;  %vm58_vm0 = vcmask 261120   ;;  %v31_v4 = vld [vmem:[%s576_s1 + $0x8] sm:$0xff]  ;;  %v441_v5 = vmov 0   ;;  %v36_v6 = vld [vmem:[%s577_s2 + $0x10] sm:$0xff] }
   0x4   :  { %v30_v2 = vld [vmem:[%s576_s1] sm:$0xff]  ;;  %383 = vmatprep.subr.msk.mxu0 %vm58_vm0, %v29_v1  ;;  %415 = vset.pattern.permute.xlu0 %v441_v5  ;;  %v32_v7 = vld [vmem:[%s576_s1 + $0x10] sm:$0xff]  ;;  %v35_v8 = vld [vmem:[%s577_s2 + $0x8] sm:$0xff] }
   0x5   :  { %385 = vmatprep.mubr.msk.f32.mxu0 %vm58_vm0, %v30_v2  ;;  %v34_v3 = vld [vmem:[%s577_s2] sm:$0xff]  ;;  %384 = vmatpush3.xpose.msk.msra.mxu0 %vm58_vm0, %v29_v1  ;;  %v37_v9 = vld [vmem:[%s577_s2 + $0x18] sm:$0xff] }
   0x6   :  { %40 = vperm.xlu0 %415, %v34_v3   ;;  %416 = vset.pattern.permute.xlu1 %v441_v5  ;;  %v33_v10 = vld [vmem:[%s576_s1 + $0x18] sm:$0xff] }
   0x7   :  { %50 = vperm.xlu1 %416, %v36_v6  }
   0x8   :  { %386 = vmatmul.mubr.msk.f32.vlgmr.msra.gmra.mrb[0].mxu0 %vm58_vm0, %v31_v4 }
   0x9   :  { %388 = vmatprep.mubr.msk.f32.mxu0 %vm58_vm0, %v32_v7 }
   0xa   :  { %14 = vsyncpa [#allocation4], 0  ;;  %45 = vperm.xlu0 %415, %v35_v8   ;;  %v167_v11 = vld [vmem:[%s579_s4] sm:$0xff]  ;;  %v168_v12 = vld [vmem:[%s579_s4 + $0x8] sm:$0xff]  ;;  %vm320_vm1 = vcmask 64512   ;;  %v340_v8 = vlaneseq  ;;  %vm345_vm2 = vcmask 57344  }
   0xb   :  { %55 = vperm.xlu1 %416, %v37_v9   ;;  %v169_v13 = vld [vmem:[%s579_s4 + $0x10] sm:$0xff]  ;;  %v170_v14 = vld [vmem:[%s579_s4 + $0x18] sm:$0xff]  ;;  %v292_v15 = vld [vmem:[%s580_s5] sm:$0xff] }
   0xc   :  { %389 = vmatmul.mubr.msk.f32.gmra.mrb[2].mxu0 %vm58_vm0, %v33_v10  ;;  %v293_v16 = vld [vmem:[%s580_s5 + $0x8] sm:$0xff]  ;;  %v294_v17 = vld [vmem:[%s580_s5 + $0x10] sm:$0xff]  ;;  %v295_v18 = vld [vmem:[%s580_s5 + $0x18] sm:$0xff] }
   0xd   :  { %v334_v19 = vld [vmem:[#allocation2] sm:$0x1]  ;;  %v164_v39 = vld [vmem:[%s578_s3 + $0x8] sm:$0xff]  ;;  %v165_v40 = vld [vmem:[%s578_s3 + $0x10] sm:$0xff] }
   0xe   :  { %173 = vperm.xlu0 %415, %v167_v11   ;;  %v163_v20 = vld [vmem:[%s578_s3] sm:$0xff]  ;;  %v166_v41 = vld [vmem:[%s578_s3 + $0x18] sm:$0xff]  ;;  %v341_v11 = vshrl.u32 %v340_v8, 7  ;;  %s442_s3 = smov [#allocation3]  }
   0xf   :  { %178 = vperm.xlu1 %416, %v168_v12   ;;  %399 = vmatprep.mubr.msk.f32.mxu1 %vm58_vm0, %v163_v20  ;;  %s353_s14 = sshll.u32 %s442_s3, 4  ;;  %s354_s14 = int_to_ptr.vmem [resolvable:$true] %s353_s14 }
  0x10   :  { %s417_s15 = scalar_lea.vmem %s354_s14, 16  ;;  %s421_s16 = scalar_lea.vmem %s354_s14, 32 }
  0x11   :  { %p418_p0 = scmp.ne.s32.totalorder %s354_s14, %s417_s15  ;;  %p422_p1 = scmp.lt.s32.totalorder %s354_s14, %s354_s14 }
  0x12   :  { %183 = vperm.xlu0 %415, %v169_v13   ;;  %p423_p2 = scmp.lt.s32.totalorder %s421_s16, %s417_s15 }
  0x13   :  { %188 = vperm.xlu1 %416, %v170_v14   ;;  %v342_v14 = vsub.s32 0, %v341_v11 }
  0x14   :  { %p424_p3 = por %p423_p2, %p422_p1 }
  0x16   :  { %298 = vperm.xlu0 %415, %v292_v15   ;;  %p425_p4 = pnand %p424_p3, %p418_p0 }
  0x17   :  { %303 = vperm.xlu1 %416, %v293_v16  }
  0x1a   :  { %308 = vperm.xlu0 %415, %v294_v17  }
  0x1b   :  { %313 = vperm.xlu1 %416, %v295_v18  }
  0x1e   :  { %337 = vperm.xlu0 %415, %v334_v19  }
  0x85   :  { %v41_v21 = vpop.permute.xlu0 %40 }
  0x86   :  { %v51_v22 = vpop.permute.xlu1 %50 }
  0x89   :  { %v46_v23 = vpop.permute.xlu0 %45 }
  0x8a   :  { %v56_v29 = vpop.permute.xlu1 %55 }
  0x8d   :  { %v174_v42 = vpop.permute.xlu0 %173 }
  0x8e   :  { %v179_v43 = vpop.permute.xlu1 %178 }
  0x91   :  { %v184_v44 = vpop.permute.xlu0 %183 }
  0x92   :  { %v189_v45 = vpop.permute.xlu1 %188 }
  0x95   :  { %v299_v50 = vpop.permute.xlu0 %298 }
  0x96   :  { %v304_v51 = vpop.permute.xlu1 %303 }
  0x99   :  { %v309_v0 = vpop.permute.xlu0 %308 }
  0x9a   :  { %v314_v1 = vpop.permute.xlu1 %313 }
  0x9d   :  { %v338_v16 = vpop.permute.xlu0 %337 }
  0x9e   :  { %v343_v18 = vrot.slane %v338_v16, %v342_v14 }
  0xdb   :  { %v387_v24 = vpop.f32.mrb[0].mxu0 }
  0xdc   :  { %v146_v25 = vadd.f32 %v387_v24, %v46_v23  ;;  %v140_v26 = vpop.f32.mrb[1].mxu0 }
  0xdd   :  { %v141_v27 = vadd.f32 %v140_v26, %v41_v21 }
  0xde   :  { %v160_v28 = vmax.f32 %v146_v25, 0.0 }
  0xdf   :  { %v159_v30 = vmax.f32 %v141_v27, 0.0  ;;  %v390_v31 = vpop.f32.mrb[2].mxu0 }
  0xe0   :  { %v156_v32 = vadd.f32 %v390_v31, %v56_v29  ;;  %v150_v33 = vpop.f32.mrb[3].mxu0 }
  0xe1   :  { %v151_v34 = vadd.f32 %v150_v33, %v51_v22  ;;  %v405_v35 = vpack.c.bf16 %v160_v28, %v159_v30 }
  0xe2   :  { %v162_v36 = vmax.f32 %v156_v32, 0.0 }
  0xe3   :  { %v161_v37 = vmax.f32 %v151_v34, 0.0  ;;  %406 = vmatprep.subr.bf16.mxu1 %v405_v35 }
  0xe4   :  { %408 = vmatpush3.bf16.msra.mxu1 %v405_v35 }
  0xe5   :  { %v409_v38 = vpack.c.bf16 %v162_v36, %v161_v37 }
  0xe7   :  { %410 = vmatprep.subr.bf16.mxu1 %v409_v38 }
  0xe8   :  { %412 = vmatpush3.bf16.msra.mxu1 %v409_v38 }
  0xeb   :  { %400 = vmatmul.mubr.msk.f32.vlgmr.msra.gmra.mrb[0].mxu1 %vm58_vm0, %v164_v39 }
  0xec   :  { %402 = vmatprep.mubr.msk.f32.mxu1 %vm58_vm0, %v165_v40 }
  0xef   :  { %403 = vmatmul.mubr.msk.f32.gmra.mrb[2].mxu1 %vm58_vm0, %v166_v41 }
 0x1be   :  { %v401_v46 = vpop.f32.mrb[0].mxu1 }
 0x1bf   :  { %v275_v47 = vadd.f32 %v401_v46, %v179_v43  ;;  %v269_v48 = vpop.f32.mrb[1].mxu1 }
 0x1c0   :  { %v270_v49 = vadd.f32 %v269_v48, %v174_v42 }
 0x1c1   :  { %v289_v52 = vmax.f32 %v275_v47, 0.0 }
 0x1c2   :  { %v288_v53 = vmax.f32 %v270_v49, 0.0  ;;  %v404_v54 = vpop.f32.mrb[2].mxu1 }
 0x1c3   :  { %v317_v55 = vmul.f32 %v304_v51, %v289_v52  ;;  %v285_v56 = vadd.f32 %v404_v54, %v189_v45  ;;  %v279_v57 = vpop.f32.mrb[3].mxu1 }
 0x1c4   :  { %v316_v58 = vmul.f32 %v299_v50, %v288_v53  ;;  %v280_v59 = vadd.f32 %v279_v57, %v184_v44 }
 0x1c5   :  { %v322_v60 = vsel %vm320_vm1, %v317_v55, 0.0  ;;  %v291_v61 = vmax.f32 %v285_v56, 0.0 }
 0x1c6   :  { %v321_v62 = vsel %vm320_vm1, %v316_v58, 0.0  ;;  %v290_v63 = vmax.f32 %v280_v59, 0.0 }
 0x1c7   :  { %v323_v2 = vadd.f32 %v322_v60, %v321_v62  ;;  %v319_v3 = vmul.f32 %v314_v1, %v291_v61 }
 0x1c8   :  { %v318_v4 = vmul.f32 %v309_v0, %v290_v63 }
 0x1c9   :  { %v326_v7 = vsel %vm320_vm1, %v319_v3, 0.0 }
 0x1ca   :  { %v324_v5 = vsel %vm320_vm1, %v318_v4, 0.0 }
 0x1cb   :  { %v325_v6 = vadd.f32 %v324_v5, %v323_v2 }
 0x1cd   :  { %v327_v9 = vadd.f32 %v326_v7, %v325_v6 }
 0x1cf   :  { %v328_v10 = vrot.slane %v327_v9, 4 }
 0x1d1   :  { %v329_v12 = vadd.f32 %v328_v10, %v327_v9 }
 0x1d3   :  { %v330_v13 = vrot.slane %v329_v12, 2 }
 0x1d5   :  { %v331_v15 = vadd.f32 %v330_v13, %v329_v12 }
 0x1d7   :  { %v332_v17 = vrot.slane %v331_v15, 1 }
 0x1d9   :  { %v333_v19 = vadd.f32 %v332_v17, %v331_v15 }
 0x1db   :  { %v344_v20 = vadd.f32 %v343_v18, %v333_v19 }
 0x1dd   :  { %346 = vst.msk [vmem:[#allocation3] sm:$0x1] %vm345_vm2, %v344_v20 }
 0x1de   :  { %428 = shalt.err (!%p425_p4)
}
 0x1df   :  { %s429_s19 = scalar_lea.hbm %s582_s7, 16 }
 0x1e0   :  { %p430_p5 = scmp.ne.s32.totalorder %s582_s7, %s429_s19  ;;  %p433_p6 = scmp.lt.u32.totalorder %s429_s19, %s582_s7 }
 0x1e2   :  { %p435_p7 = pnand %p433_p6, %p430_p5 }
 0x1e4   :  { %438 = shalt.err (!%p435_p7)
}
 0x1e5   :  { %356 = dma.vmem_to_hbm [thread:$0]  %s354_s14, 16, %s582_s7, [#allocation4]  }
 0x1e6   :  { %439 = dma.done.wait [#allocation4], 16  }
 0x1e7   :  { %440 = vsyncadd [#allocation4], 4294967280 }
 0x1e8   :  { %360 = vsyncpa [#allocation4], 1 }

</bundles_post_ra>
